<compile_context>
chip_gen: v7x
topology: tpu7x:2x2x1
jax: 0.10.0
libtpu: 0.0.40
codegen_flags: <defaults>
</compile_context>

<pallas_src>
import functools

import numpy as np
import jax
import jax.numpy as jnp
from jax.experimental import pallas as pl
from jax.experimental.pallas import tpu as pltpu


def _mha_kernel(n_head, d_k, d_v, len_q, len_k, bb, eps, operand_dtype,
                q_ref, kv_ref,
                wq_ref, bq_ref, wkv_ref, bkv_ref,
                wfc_ref, bfc_ref, gamma_ref, beta_ref,
                out_ref, attn_ref):
    f32 = jnp.float32
    cast = lambda t: t.astype(operand_dtype)

    xq = q_ref[...]                      # (bb*Lq, D)   f32 (also the residual)
    xkv = kv_ref[...]                    # (bb*Lk, 2D)  f32, [k | v] lane-concat
    d_model = out_ref.shape[-1]

    # --- fused projections ---------------------------------------------------
    # Q: 1/sqrt(d_k) already folded into wq/bq wrapper-side.
    q_proj = jnp.dot(cast(xq), cast(wq_ref[...]),
                     preferred_element_type=f32) + bq_ref[...]      # (bb*Lq, H*dk)
    # K|V: one block-diagonal matmul for both projections.
    kv_proj = jnp.dot(cast(xkv), cast(wkv_ref[...]),
                      preferred_element_type=f32) + bkv_ref[...]    # (bb*Lk, H*dk+H*dv)
    k_proj = kv_proj[:, :n_head * d_k]
    v_proj = kv_proj[:, n_head * d_k:]

    # Free leading-dim splits (Lq/Lk sublane-tile aligned at these shapes).
    q3 = q_proj.reshape(bb, len_q, n_head * d_k)
    k3 = k_proj.reshape(bb, len_k, n_head * d_k)
    v3 = v_proj.reshape(bb, len_k, n_head * d_v)

    wfc = wfc_ref[...]                   # (H*dv, D)
    acc = jnp.zeros((bb * len_q, d_model), f32)
    attn_pieces = []

    # --- per-head attention (unrolled over H, batched over bb) ---------------
    for h in range(n_head):
        qh = q3[:, :, h * d_k:(h + 1) * d_k]           # (bb, Lq, dk)
        kh = k3[:, :, h * d_k:(h + 1) * d_k]           # (bb, Lk, dk)
        vh = v3[:, :, h * d_v:(h + 1) * d_v]           # (bb, Lk, dv)

        # Scores already carry the 1/sqrt(d_k) scale (folded into wq).
        s = jnp.einsum('bqd,bkd->bqk', cast(qh), cast(kh),
                       preferred_element_type=f32)     # (bb, Lq, Lk)
        m = jnp.max(s, axis=-1, keepdims=True)
        e = jnp.exp(s - m)
        inv = pl.reciprocal(jnp.sum(e, axis=-1, keepdims=True))   # exact; multiply
        a = e * inv
        attn_pieces.append(a)

        ctx = jnp.einsum('bqk,bkd->bqd', cast(a), cast(vh),
                         preferred_element_type=f32)   # (bb, Lq, dv)
        # Accumulate head contribution straight into the output projection
        # (no (Lq, H*dv) lane concat).
        acc = acc + jnp.dot(cast(ctx.reshape(bb * len_q, d_v)),
                            cast(wfc[h * d_v:(h + 1) * d_v, :]),
                            preferred_element_type=f32)

    # --- single lane-dense attention store: (bb*Lq, H*Lk) --------------------
    attn_slab = jnp.concatenate(attn_pieces, axis=-1)          # (bb, Lq, H*Lk)
    attn_ref[...] = attn_slab.reshape(bb * len_q, n_head * len_k)

    # --- output bias + residual + LayerNorm (all f32) ------------------------
    y = acc + bfc_ref[...] + xq
    mu = jnp.mean(y, axis=-1, keepdims=True)
    var = jnp.mean((y - mu) ** 2, axis=-1, keepdims=True)
    y = (y - mu) * jax.lax.rsqrt(var + eps)
    out_ref[...] = y * gamma_ref[...] + beta_ref[...]
    # TODO(synk): attention & output dropout are identity here (eval-mode);
    # mask=None path only.
    # TODO(synk): at realistic sizes (seq >= 1k) switch to a flash-style tiled
    # softmax (q/k tiles) and raise vmem_limit_bytes per generation.


def multi_head_attention(q, k, v, params, *, n_head, d_k, d_v,
                         batch_block=None, operand_dtype=jnp.float32):
    sz_b, len_q, d_model = q.shape
    _, len_k, _ = k.shape
    wq, bq, wk, bk, wv, bv, wfc, bfc, gamma, beta = params

    bb = sz_b if batch_block is None else batch_block
    assert sz_b % bb == 0, "batch_block must divide sz_b"
    n_blocks = sz_b // bb

    # Fold the 1/sqrt(d_k) attention scale into the Q projection (W and b).
    inv_temp = 1.0 / float(np.sqrt(d_k))
    wq_s = wq * inv_temp
    bq_s = bq * inv_temp

    # Block-diagonal fused K|V projection: one matmul for both K and V.
    nk, nv = n_head * d_k, n_head * d_v
    wkv = jnp.zeros((2 * d_model, nk + nv), q.dtype)
    wkv = wkv.at[:d_model, :nk].set(wk).at[d_model:, nk:].set(wv)
    bkv = jnp.concatenate([bk, bv], axis=-1)

    # Fold batch into the row (sublane) axis; lane-concat [k | v] for the
    # fused projection.  Pure layout plumbing outside the kernel.
    q2 = q.reshape(sz_b * len_q, d_model)
    kv2 = jnp.concatenate([k, v], axis=-1).reshape(sz_b * len_k, 2 * d_model)

    kernel = functools.partial(_mha_kernel, n_head, d_k, d_v, len_q, len_k,
                               bb, 1e-5, operand_dtype)

    def full_spec(arr):
        nd = arr.ndim
        return pl.BlockSpec(arr.shape, lambda i, _nd=nd: (0,) * _nd)

    out2, attn2 = pl.pallas_call(
        kernel,
        grid=(n_blocks,),
        in_specs=[
            pl.BlockSpec((bb * len_q, d_model), lambda i: (i, 0)),
            pl.BlockSpec((bb * len_k, 2 * d_model), lambda i: (i, 0)),
            full_spec(wq_s), full_spec(bq_s),
            full_spec(wkv), full_spec(bkv),
            full_spec(wfc), full_spec(bfc),
            full_spec(gamma), full_spec(beta),
        ],
        out_specs=[
            pl.BlockSpec((bb * len_q, d_model), lambda i: (i, 0)),
            pl.BlockSpec((bb * len_q, n_head * len_k), lambda i: (i, 0)),
        ],
        out_shape=[
            jax.ShapeDtypeStruct((sz_b * len_q, d_model), jnp.float32),
            jax.ShapeDtypeStruct((sz_b * len_q, n_head * len_k), jnp.float32),
        ],
        compiler_params=pltpu.CompilerParams(dimension_semantics=("parallel",)),
    )(q2, kv2, wq_s, bq_s, wkv, bkv, wfc, bfc, gamma, beta)

    out = out2.reshape(sz_b, len_q, d_model)
    # Lane-dense slab (B*Lq, H*Lk) -> PyTorch's head-major (H*B, Lq, Lk).
    attn = (attn2.reshape(sz_b, len_q, n_head, len_k)
                 .transpose(2, 0, 1, 3)
                 .reshape(n_head * sz_b, len_q, len_k))
    return out, attn


def _reference(q, k, v, params, *, n_head, d_k, d_v,
               operand_dtype=jnp.float32):
    """Pure-JAX reference matching the PyTorch forward (eval mode)."""
    wq, bq, wk, bk, wv, bv, wfc, bfc, gamma, beta = params
    sz_b, len_q, d_model = q.shape
    _, len_k, _ = k.shape
    f32 = jnp.float32
    c = lambda t: t.astype(operand_dtype)

    Q = (jnp.matmul(c(q), c(wq), preferred_element_type=f32) + bq
         ).reshape(sz_b, len_q, n_head, d_k)
    K = (jnp.matmul(c(k), c(wk), preferred_element_type=f32) + bk
         ).reshape(sz_b, len_k, n_head, d_k)
    V = (jnp.matmul(c(v), c(wv), preferred_element_type=f32) + bv
         ).reshape(sz_b, len_k, n_head, d_v)
    Q = jnp.transpose(Q, (2, 0, 1, 3)).reshape(-1, len_q, d_k)
    K = jnp.transpose(K, (2, 0, 1, 3)).reshape(-1, len_k, d_k)
    V = jnp.transpose(V, (2, 0, 1, 3)).reshape(-1, len_k, d_v)

    scores = jnp.einsum('bqd,bkd->bqk', c(Q), c(K),
                        preferred_element_type=f32) / np.sqrt(d_k)
    attn = jax.nn.softmax(scores, axis=-1)
    ctx = jnp.einsum('bqk,bkd->bqd', c(attn), c(V),
                     preferred_element_type=f32)               # (H*B, Lq, dv)
    ctx = ctx.reshape(n_head, sz_b, len_q, d_v)
    ctx = jnp.transpose(ctx, (1, 2, 0, 3)).reshape(sz_b, len_q, n_head * d_v)

    proj = jnp.matmul(c(ctx), c(wfc), preferred_element_type=f32) + bfc
    y = proj + q
    mu = jnp.mean(y, axis=-1, keepdims=True)
    var = jnp.mean((y - mu) ** 2, axis=-1, keepdims=True)
    y = (y - mu) / jnp.sqrt(var + 1e-5) * gamma + beta
    return y, attn


def make_params(key, d_model, n_head, d_k, d_v):
    ks = jax.random.split(key, 8)
    std_qk = np.sqrt(2.0 / (d_model + d_k))
    std_v = np.sqrt(2.0 / (d_model + d_v))
    std_fc = np.sqrt(2.0 / (n_head * d_v + d_model))   # xavier_normal_
    b_bound = 1.0 / np.sqrt(d_model)

    wq = std_qk * jax.random.normal(ks[0], (d_model, n_head * d_k), jnp.float32)
    wk = std_qk * jax.random.normal(ks[1], (d_model, n_head * d_k), jnp.float32)
    wv = std_v * jax.random.normal(ks[2], (d_model, n_head * d_v), jnp.float32)
    bq = jax.random.uniform(ks[3], (1, n_head * d_k), jnp.float32, -b_bound, b_bound)
    bk = jax.random.uniform(ks[4], (1, n_head * d_k), jnp.float32, -b_bound, b_bound)
    bv = jax.random.uniform(ks[5], (1, n_head * d_v), jnp.float32, -b_bound, b_bound)
    wfc = std_fc * jax.random.normal(ks[6], (n_head * d_v, d_model), jnp.float32)
    bfc = jax.random.uniform(ks[7], (1, d_model), jnp.float32,
                             -1.0 / np.sqrt(n_head * d_v), 1.0 / np.sqrt(n_head * d_v))
    gamma = jnp.ones((1, d_model), jnp.float32)
    beta = jnp.zeros((1, d_model), jnp.float32)
    return (wq, bq, wk, bk, wv, bv, wfc, bfc, gamma, beta)


if __name__ == "__main__":
    n_head, d_model, d_k, d_v = 4, 32, 8, 8
    sz_b, seq = 2, 8

    root = jax.random.PRNGKey(0)
    kq, kk, kv, kp = jax.random.split(root, 4)
    q = jax.random.normal(kq, (sz_b, seq, d_model), jnp.float32)
    k = jax.random.normal(kk, (sz_b, seq, d_model), jnp.float32)
    v = jax.random.normal(kv, (sz_b, seq, d_model), jnp.float32)
    params = make_params(kp, d_model, n_head, d_k, d_v)

    # f32 path: tight tolerance vs the pure-JAX / PyTorch-equivalent reference.
    out, attn = multi_head_attention(q, k, v, params,
                                     n_head=n_head, d_k=d_k, d_v=d_v)
    out, attn = jax.block_until_ready((out, attn))

    ref_out, ref_attn = _reference(q, k, v, params,
                                   n_head=n_head, d_k=d_k, d_v=d_v)
    np.testing.assert_allclose(np.asarray(out), np.asarray(ref_out),
                               rtol=1e-4, atol=1e-4)
    np.testing.assert_allclose(np.asarray(attn), np.asarray(ref_attn),
                               rtol=1e-4, atol=1e-4)

    # bf16 MXU-operand path (v6e/v7x): compare against a bf16-operand reference
    # at a tolerance appropriate for bf16 operand rounding.
    out_bf, attn_bf = multi_head_attention(q, k, v, params,
                                           n_head=n_head, d_k=d_k, d_v=d_v,
                                           operand_dtype=jnp.bfloat16)
    out_bf, attn_bf = jax.block_until_ready((out_bf, attn_bf))
    ref_out_bf, ref_attn_bf = _reference(q, k, v, params,
                                         n_head=n_head, d_k=d_k, d_v=d_v,
                                         operand_dtype=jnp.bfloat16)
    np.testing.assert_allclose(np.asarray(out_bf), np.asarray(ref_out_bf),
                               rtol=5e-2, atol=5e-2)
    np.testing.assert_allclose(np.asarray(attn_bf), np.asarray(ref_attn_bf),
                               rtol=5e-2, atol=5e-2)

    print("KERNEL_OK")
</pallas_src>

<mosaic_0001>
module attributes {stable_mosaic.version = 11 : i64} {
  func.func @_mha_kernel(%arg0: i32, %arg1: memref<16x32xf32, #tpu.memory_space<vmem>>, %arg2: memref<16x64xf32, #tpu.memory_space<vmem>>, %arg3: memref<32x32xf32, #tpu.memory_space<vmem>>, %arg4: memref<1x32xf32, #tpu.memory_space<vmem>>, %arg5: memref<64x64xf32, #tpu.memory_space<vmem>>, %arg6: memref<1x64xf32, #tpu.memory_space<vmem>>, %arg7: memref<32x32xf32, #tpu.memory_space<vmem>>, %arg8: memref<1x32xf32, #tpu.memory_space<vmem>>, %arg9: memref<1x32xf32, #tpu.memory_space<vmem>>, %arg10: memref<1x32xf32, #tpu.memory_space<vmem>>, %arg11: memref<16x32xf32, #tpu.memory_space<vmem>>, %arg12: memref<16x32xf32, #tpu.memory_space<vmem>>) attributes {dimension_semantics = [#tpu.dimension_semantics<parallel>], iteration_bounds = array<i64: 1>, scalar_prefetch = 0 : i64, scratch_operands = 0 : i64, tpu.core_type = #tpu.core_type<tc>, window_params = [{transform_indices = @transform_0, window_bounds = array<i64: 16, 32>}, {transform_indices = @transform_1, window_bounds = array<i64: 16, 64>}, {pipeline_mode = #tpu.pipeline_mode<synchronous>, transform_indices = @transform_2, window_bounds = array<i64: 32, 32>}, {pipeline_mode = #tpu.pipeline_mode<synchronous>, transform_indices = @transform_3, window_bounds = array<i64: 1, 32>}, {pipeline_mode = #tpu.pipeline_mode<synchronous>, transform_indices = @transform_4, window_bounds = array<i64: 64, 64>}, {pipeline_mode = #tpu.pipeline_mode<synchronous>, transform_indices = @transform_5, window_bounds = array<i64: 1, 64>}, {pipeline_mode = #tpu.pipeline_mode<synchronous>, transform_indices = @transform_6, window_bounds = array<i64: 32, 32>}, {pipeline_mode = #tpu.pipeline_mode<synchronous>, transform_indices = @transform_7, window_bounds = array<i64: 1, 32>}, {pipeline_mode = #tpu.pipeline_mode<synchronous>, transform_indices = @transform_8, window_bounds = array<i64: 1, 32>}, {pipeline_mode = #tpu.pipeline_mode<synchronous>, transform_indices = @transform_9, window_bounds = array<i64: 1, 32>}, {transform_indices = @transform_10, window_bounds = array<i64: 16, 32>}, {transform_indices = @transform_11, window_bounds = array<i64: 16, 32>}]} {
    %c0 = arith.constant 0 : index
    %c0_0 = arith.constant 0 : index
    %0 = vector.load %arg1[%c0, %c0_0] : memref<16x32xf32, #tpu.memory_space<vmem>>, vector<16x32xf32>
    %c0_1 = arith.constant 0 : index
    %c0_2 = arith.constant 0 : index
    %1 = vector.load %arg2[%c0_1, %c0_2] : memref<16x64xf32, #tpu.memory_space<vmem>>, vector<16x64xf32>
    %c0_3 = arith.constant 0 : index
    %c0_4 = arith.constant 0 : index
    %2 = vector.load %arg3[%c0_3, %c0_4] : memref<32x32xf32, #tpu.memory_space<vmem>>, vector<32x32xf32>
    %cst = arith.constant dense<0.000000e+00> : vector<16x32xf32>
    %3 = tpu.matmul %0, %2, %cst {dimension_numbers = #tpu.dot_dimension_numbers<[1], [0], [0], [1], [0, 0, 1, 1], [], []>} : vector<16x32xf32>, vector<32x32xf32>, vector<16x32xf32> -> vector<16x32xf32>
    %c0_5 = arith.constant 0 : index
    %c0_6 = arith.constant 0 : index
    %4 = vector.load %arg4[%c0_5, %c0_6] : memref<1x32xf32, #tpu.memory_space<vmem>>, vector<1x32xf32>
    %5 = vector.broadcast %4 : vector<1x32xf32> to vector<16x32xf32>
    %6 = arith.addf %3, %5 : vector<16x32xf32>
    %c0_7 = arith.constant 0 : index
    %c0_8 = arith.constant 0 : index
    %7 = vector.load %arg5[%c0_7, %c0_8] : memref<64x64xf32, #tpu.memory_space<vmem>>, vector<64x64xf32>
    %cst_9 = arith.constant dense<0.000000e+00> : vector<16x64xf32>
    %8 = tpu.matmul %1, %7, %cst_9 {dimension_numbers = #tpu.dot_dimension_numbers<[1], [0], [0], [1], [0, 0, 1, 1], [], []>} : vector<16x64xf32>, vector<64x64xf32>, vector<16x64xf32> -> vector<16x64xf32>
    %c0_10 = arith.constant 0 : index
    %c0_11 = arith.constant 0 : index
    %9 = vector.load %arg6[%c0_10, %c0_11] : memref<1x64xf32, #tpu.memory_space<vmem>>, vector<1x64xf32>
    %10 = vector.broadcast %9 : vector<1x64xf32> to vector<16x64xf32>
    %11 = arith.addf %8, %10 : vector<16x64xf32>
    %12 = vector.extract_strided_slice %11 {offsets = [0, 0], sizes = [16, 32], strides = [1, 1]} : vector<16x64xf32> to vector<16x32xf32>
    %13 = vector.extract_strided_slice %11 {offsets = [0, 32], sizes = [16, 32], strides = [1, 1]} : vector<16x64xf32> to vector<16x32xf32>
    %14 = vector.shape_cast %6 : vector<16x32xf32> to vector<2x8x32xf32>
    %15 = vector.shape_cast %12 : vector<16x32xf32> to vector<2x8x32xf32>
    %16 = vector.shape_cast %13 : vector<16x32xf32> to vector<2x8x32xf32>
    %c0_12 = arith.constant 0 : index
    %c0_13 = arith.constant 0 : index
    %17 = vector.load %arg7[%c0_12, %c0_13] : memref<32x32xf32, #tpu.memory_space<vmem>>, vector<32x32xf32>
    %cst_14 = arith.constant 0.000000e+00 : f32
    %18 = vector.broadcast %cst_14 : f32 to vector<16x32xf32>
    %19 = vector.extract_strided_slice %14 {offsets = [0, 0, 0], sizes = [2, 8, 8], strides = [1, 1, 1]} : vector<2x8x32xf32> to vector<2x8x8xf32>
    %20 = vector.extract_strided_slice %15 {offsets = [0, 0, 0], sizes = [2, 8, 8], strides = [1, 1, 1]} : vector<2x8x32xf32> to vector<2x8x8xf32>
    %21 = vector.extract_strided_slice %16 {offsets = [0, 0, 0], sizes = [2, 8, 8], strides = [1, 1, 1]} : vector<2x8x32xf32> to vector<2x8x8xf32>
    "tpu.trace_start"() <{level = 10 : i32, message = "bqd,bkd->bqk"}> : () -> ()
    %cst_15 = arith.constant dense<0.000000e+00> : vector<2x8x8xf32>
    %22 = tpu.matmul %19, %20, %cst_15 {dimension_numbers = #tpu.dot_dimension_numbers<[2], [2], [1], [1], [0, 0, 0, 1, 1, 1], [0], [0]>} : vector<2x8x8xf32>, vector<2x8x8xf32>, vector<2x8x8xf32> -> vector<2x8x8xf32>
    "tpu.trace_stop"() : () -> ()
    %cst_16 = arith.constant dense<0xFF800000> : vector<2x8xf32>
    %23 = vector.multi_reduction <maximumf>, %22, %cst_16 [2] : vector<2x8x8xf32> to vector<2x8xf32>
    %24 = vector.shape_cast %23 : vector<2x8xf32> to vector<2x8x1xf32>
    %25 = vector.broadcast %24 : vector<2x8x1xf32> to vector<2x8x8xf32>
    %26 = arith.subf %22, %25 : vector<2x8x8xf32>
    %27 = math.exp %26 : vector<2x8x8xf32>
    %cst_17 = arith.constant dense<0.000000e+00> : vector<2x8xf32>
    %28 = vector.multi_reduction <add>, %27, %cst_17 [2] : vector<2x8x8xf32> to vector<2x8xf32>
    %29 = vector.shape_cast %28 : vector<2x8xf32> to vector<2x8x1xf32>
    %30 = tpu.reciprocal %29 : vector<2x8x1xf32> -> vector<2x8x1xf32>
    %31 = vector.broadcast %30 : vector<2x8x1xf32> to vector<2x8x8xf32>
    %32 = arith.mulf %27, %31 : vector<2x8x8xf32>
    "tpu.trace_start"() <{level = 10 : i32, message = "bqk,bkd->bqd"}> : () -> ()
    %cst_18 = arith.constant dense<0.000000e+00> : vector<2x8x8xf32>
    %33 = tpu.matmul %32, %21, %cst_18 {dimension_numbers = #tpu.dot_dimension_numbers<[2], [1], [1], [2], [0, 0, 0, 1, 1, 2], [0], [0]>} : vector<2x8x8xf32>, vector<2x8x8xf32>, vector<2x8x8xf32> -> vector<2x8x8xf32>
    "tpu.trace_stop"() : () -> ()
    %34 = vector.shape_cast %33 : vector<2x8x8xf32> to vector<16x8xf32>
    %35 = vector.extract_strided_slice %17 {offsets = [0, 0], sizes = [8, 32], strides = [1, 1]} : vector<32x32xf32> to vector<8x32xf32>
    %cst_19 = arith.constant dense<0.000000e+00> : vector<16x32xf32>
    %36 = tpu.matmul %34, %35, %cst_19 {dimension_numbers = #tpu.dot_dimension_numbers<[1], [0], [0], [1], [0, 0, 1, 1], [], []>} : vector<16x8xf32>, vector<8x32xf32>, vector<16x32xf32> -> vector<16x32xf32>
    %37 = arith.addf %18, %36 : vector<16x32xf32>
    %38 = vector.extract_strided_slice %14 {offsets = [0, 0, 8], sizes = [2, 8, 8], strides = [1, 1, 1]} : vector<2x8x32xf32> to vector<2x8x8xf32>
    %39 = vector.extract_strided_slice %15 {offsets = [0, 0, 8], sizes = [2, 8, 8], strides = [1, 1, 1]} : vector<2x8x32xf32> to vector<2x8x8xf32>
    %40 = vector.extract_strided_slice %16 {offsets = [0, 0, 8], sizes = [2, 8, 8], strides = [1, 1, 1]} : vector<2x8x32xf32> to vector<2x8x8xf32>
    "tpu.trace_start"() <{level = 10 : i32, message = "bqd,bkd->bqk"}> : () -> ()
    %cst_20 = arith.constant dense<0.000000e+00> : vector<2x8x8xf32>
    %41 = tpu.matmul %38, %39, %cst_20 {dimension_numbers = #tpu.dot_dimension_numbers<[2], [2], [1], [1], [0, 0, 0, 1, 1, 1], [0], [0]>} : vector<2x8x8xf32>, vector<2x8x8xf32>, vector<2x8x8xf32> -> vector<2x8x8xf32>
    "tpu.trace_stop"() : () -> ()
    %cst_21 = arith.constant dense<0xFF800000> : vector<2x8xf32>
    %42 = vector.multi_reduction <maximumf>, %41, %cst_21 [2] : vector<2x8x8xf32> to vector<2x8xf32>
    %43 = vector.shape_cast %42 : vector<2x8xf32> to vector<2x8x1xf32>
    %44 = vector.broadcast %43 : vector<2x8x1xf32> to vector<2x8x8xf32>
    %45 = arith.subf %41, %44 : vector<2x8x8xf32>
    %46 = math.exp %45 : vector<2x8x8xf32>
    %cst_22 = arith.constant dense<0.000000e+00> : vector<2x8xf32>
    %47 = vector.multi_reduction <add>, %46, %cst_22 [2] : vector<2x8x8xf32> to vector<2x8xf32>
    %48 = vector.shape_cast %47 : vector<2x8xf32> to vector<2x8x1xf32>
    %49 = tpu.reciprocal %48 : vector<2x8x1xf32> -> vector<2x8x1xf32>
    %50 = vector.broadcast %49 : vector<2x8x1xf32> to vector<2x8x8xf32>
    %51 = arith.mulf %46, %50 : vector<2x8x8xf32>
    "tpu.trace_start"() <{level = 10 : i32, message = "bqk,bkd->bqd"}> : () -> ()
    %cst_23 = arith.constant dense<0.000000e+00> : vector<2x8x8xf32>
    %52 = tpu.matmul %51, %40, %cst_23 {dimension_numbers = #tpu.dot_dimension_numbers<[2], [1], [1], [2], [0, 0, 0, 1, 1, 2], [0], [0]>} : vector<2x8x8xf32>, vector<2x8x8xf32>, vector<2x8x8xf32> -> vector<2x8x8xf32>
    "tpu.trace_stop"() : () -> ()
    %53 = vector.shape_cast %52 : vector<2x8x8xf32> to vector<16x8xf32>
    %54 = vector.extract_strided_slice %17 {offsets = [8, 0], sizes = [8, 32], strides = [1, 1]} : vector<32x32xf32> to vector<8x32xf32>
    %cst_24 = arith.constant dense<0.000000e+00> : vector<16x32xf32>
    %55 = tpu.matmul %53, %54, %cst_24 {dimension_numbers = #tpu.dot_dimension_numbers<[1], [0], [0], [1], [0, 0, 1, 1], [], []>} : vector<16x8xf32>, vector<8x32xf32>, vector<16x32xf32> -> vector<16x32xf32>
    %56 = arith.addf %37, %55 : vector<16x32xf32>
    %57 = vector.extract_strided_slice %14 {offsets = [0, 0, 16], sizes = [2, 8, 8], strides = [1, 1, 1]} : vector<2x8x32xf32> to vector<2x8x8xf32>
    %58 = vector.extract_strided_slice %15 {offsets = [0, 0, 16], sizes = [2, 8, 8], strides = [1, 1, 1]} : vector<2x8x32xf32> to vector<2x8x8xf32>
    %59 = vector.extract_strided_slice %16 {offsets = [0, 0, 16], sizes = [2, 8, 8], strides = [1, 1, 1]} : vector<2x8x32xf32> to vector<2x8x8xf32>
    "tpu.trace_start"() <{level = 10 : i32, message = "bqd,bkd->bqk"}> : () -> ()
    %cst_25 = arith.constant dense<0.000000e+00> : vector<2x8x8xf32>
    %60 = tpu.matmul %57, %58, %cst_25 {dimension_numbers = #tpu.dot_dimension_numbers<[2], [2], [1], [1], [0, 0, 0, 1, 1, 1], [0], [0]>} : vector<2x8x8xf32>, vector<2x8x8xf32>, vector<2x8x8xf32> -> vector<2x8x8xf32>
    "tpu.trace_stop"() : () -> ()
    %cst_26 = arith.constant dense<0xFF800000> : vector<2x8xf32>
    %61 = vector.multi_reduction <maximumf>, %60, %cst_26 [2] : vector<2x8x8xf32> to vector<2x8xf32>
    %62 = vector.shape_cast %61 : vector<2x8xf32> to vector<2x8x1xf32>
    %63 = vector.broadcast %62 : vector<2x8x1xf32> to vector<2x8x8xf32>
    %64 = arith.subf %60, %63 : vector<2x8x8xf32>
    %65 = math.exp %64 : vector<2x8x8xf32>
    %cst_27 = arith.constant dense<0.000000e+00> : vector<2x8xf32>
    %66 = vector.multi_reduction <add>, %65, %cst_27 [2] : vector<2x8x8xf32> to vector<2x8xf32>
    %67 = vector.shape_cast %66 : vector<2x8xf32> to vector<2x8x1xf32>
    %68 = tpu.reciprocal %67 : vector<2x8x1xf32> -> vector<2x8x1xf32>
    %69 = vector.broadcast %68 : vector<2x8x1xf32> to vector<2x8x8xf32>
    %70 = arith.mulf %65, %69 : vector<2x8x8xf32>
    "tpu.trace_start"() <{level = 10 : i32, message = "bqk,bkd->bqd"}> : () -> ()
    %cst_28 = arith.constant dense<0.000000e+00> : vector<2x8x8xf32>
    %71 = tpu.matmul %70, %59, %cst_28 {dimension_numbers = #tpu.dot_dimension_numbers<[2], [1], [1], [2], [0, 0, 0, 1, 1, 2], [0], [0]>} : vector<2x8x8xf32>, vector<2x8x8xf32>, vector<2x8x8xf32> -> vector<2x8x8xf32>
    "tpu.trace_stop"() : () -> ()
    %72 = vector.shape_cast %71 : vector<2x8x8xf32> to vector<16x8xf32>
    %73 = vector.extract_strided_slice %17 {offsets = [16, 0], sizes = [8, 32], strides = [1, 1]} : vector<32x32xf32> to vector<8x32xf32>
    %cst_29 = arith.constant dense<0.000000e+00> : vector<16x32xf32>
    %74 = tpu.matmul %72, %73, %cst_29 {dimension_numbers = #tpu.dot_dimension_numbers<[1], [0], [0], [1], [0, 0, 1, 1], [], []>} : vector<16x8xf32>, vector<8x32xf32>, vector<16x32xf32> -> vector<16x32xf32>
    %75 = arith.addf %56, %74 : vector<16x32xf32>
    %76 = vector.extract_strided_slice %14 {offsets = [0, 0, 24], sizes = [2, 8, 8], strides = [1, 1, 1]} : vector<2x8x32xf32> to vector<2x8x8xf32>
    %77 = vector.extract_strided_slice %15 {offsets = [0, 0, 24], sizes = [2, 8, 8], strides = [1, 1, 1]} : vector<2x8x32xf32> to vector<2x8x8xf32>
    %78 = vector.extract_strided_slice %16 {offsets = [0, 0, 24], sizes = [2, 8, 8], strides = [1, 1, 1]} : vector<2x8x32xf32> to vector<2x8x8xf32>
    "tpu.trace_start"() <{level = 10 : i32, message = "bqd,bkd->bqk"}> : () -> ()
    %cst_30 = arith.constant dense<0.000000e+00> : vector<2x8x8xf32>
    %79 = tpu.matmul %76, %77, %cst_30 {dimension_numbers = #tpu.dot_dimension_numbers<[2], [2], [1], [1], [0, 0, 0, 1, 1, 1], [0], [0]>} : vector<2x8x8xf32>, vector<2x8x8xf32>, vector<2x8x8xf32> -> vector<2x8x8xf32>
    "tpu.trace_stop"() : () -> ()
    %cst_31 = arith.constant dense<0xFF800000> : vector<2x8xf32>
    %80 = vector.multi_reduction <maximumf>, %79, %cst_31 [2] : vector<2x8x8xf32> to vector<2x8xf32>
    %81 = vector.shape_cast %80 : vector<2x8xf32> to vector<2x8x1xf32>
    %82 = vector.broadcast %81 : vector<2x8x1xf32> to vector<2x8x8xf32>
    %83 = arith.subf %79, %82 : vector<2x8x8xf32>
    %84 = math.exp %83 : vector<2x8x8xf32>
    %cst_32 = arith.constant dense<0.000000e+00> : vector<2x8xf32>
    %85 = vector.multi_reduction <add>, %84, %cst_32 [2] : vector<2x8x8xf32> to vector<2x8xf32>
    %86 = vector.shape_cast %85 : vector<2x8xf32> to vector<2x8x1xf32>
    %87 = tpu.reciprocal %86 : vector<2x8x1xf32> -> vector<2x8x1xf32>
    %88 = vector.broadcast %87 : vector<2x8x1xf32> to vector<2x8x8xf32>
    %89 = arith.mulf %84, %88 : vector<2x8x8xf32>
    "tpu.trace_start"() <{level = 10 : i32, message = "bqk,bkd->bqd"}> : () -> ()
    %cst_33 = arith.constant dense<0.000000e+00> : vector<2x8x8xf32>
    %90 = tpu.matmul %89, %78, %cst_33 {dimension_numbers = #tpu.dot_dimension_numbers<[2], [1], [1], [2], [0, 0, 0, 1, 1, 2], [0], [0]>} : vector<2x8x8xf32>, vector<2x8x8xf32>, vector<2x8x8xf32> -> vector<2x8x8xf32>
    "tpu.trace_stop"() : () -> ()
    %91 = vector.shape_cast %90 : vector<2x8x8xf32> to vector<16x8xf32>
    %92 = vector.extract_strided_slice %17 {offsets = [24, 0], sizes = [8, 32], strides = [1, 1]} : vector<32x32xf32> to vector<8x32xf32>
    %cst_34 = arith.constant dense<0.000000e+00> : vector<16x32xf32>
    %93 = tpu.matmul %91, %92, %cst_34 {dimension_numbers = #tpu.dot_dimension_numbers<[1], [0], [0], [1], [0, 0, 1, 1], [], []>} : vector<16x8xf32>, vector<8x32xf32>, vector<16x32xf32> -> vector<16x32xf32>
    %94 = arith.addf %75, %93 : vector<16x32xf32>
    %95 = tpu.concatenate %32, %51, %70, %89 in 2 : vector<2x8x8xf32>, vector<2x8x8xf32>, vector<2x8x8xf32>, vector<2x8x8xf32> -> vector<2x8x32xf32>
    %96 = vector.shape_cast %95 : vector<2x8x32xf32> to vector<16x32xf32>
    %c0_35 = arith.constant 0 : index
    %c0_36 = arith.constant 0 : index
    %97 = vector.load %arg12[%c0_35, %c0_36] : memref<16x32xf32, #tpu.memory_space<vmem>>, vector<16x32xf32>
    tpu.vector_store %arg12[%c0_35, %c0_36], %96 {strides = array<i32>} : memref<16x32xf32, #tpu.memory_space<vmem>>, vector<16x32xf32>,
    %c0_37 = arith.constant 0 : index
    %c0_38 = arith.constant 0 : index
    %98 = vector.load %arg8[%c0_37, %c0_38] : memref<1x32xf32, #tpu.memory_space<vmem>>, vector<1x32xf32>
    %99 = vector.broadcast %98 : vector<1x32xf32> to vector<16x32xf32>
    %100 = arith.addf %94, %99 : vector<16x32xf32>
    %101 = arith.addf %100, %0 : vector<16x32xf32>
    %cst_39 = arith.constant dense<0.000000e+00> : vector<16xf32>
    %102 = vector.multi_reduction <add>, %101, %cst_39 [1] : vector<16x32xf32> to vector<16xf32>
    %103 = vector.shape_cast %102 : vector<16xf32> to vector<16x1xf32>
    %cst_40 = arith.constant 3.200000e+01 : f32
    %104 = vector.broadcast %cst_40 : f32 to vector<16x1xf32>
    %105 = arith.divf %103, %104 : vector<16x1xf32>
    %106 = vector.broadcast %105 : vector<16x1xf32> to vector<16x32xf32>
    %107 = arith.subf %101, %106 : vector<16x32xf32>
    %108 = arith.mulf %107, %107 : vector<16x32xf32>
    %cst_41 = arith.constant dense<0.000000e+00> : vector<16xf32>
    %109 = vector.multi_reduction <add>, %108, %cst_41 [1] : vector<16x32xf32> to vector<16xf32>
    %110 = vector.shape_cast %109 : vector<16xf32> to vector<16x1xf32>
    %cst_42 = arith.constant 3.200000e+01 : f32
    %111 = vector.broadcast %cst_42 : f32 to vector<16x1xf32>
    %112 = arith.divf %110, %111 : vector<16x1xf32>
    %113 = vector.broadcast %105 : vector<16x1xf32> to vector<16x32xf32>
    %114 = arith.subf %101, %113 : vector<16x32xf32>
    %cst_43 = arith.constant 9.99999974E-6 : f32
    %115 = vector.broadcast %cst_43 : f32 to vector<16x1xf32>
    %116 = arith.addf %112, %115 : vector<16x1xf32>
    %117 = math.rsqrt %116 : vector<16x1xf32>
    %118 = vector.broadcast %117 : vector<16x1xf32> to vector<16x32xf32>
    %119 = arith.mulf %114, %118 : vector<16x32xf32>
    %c0_44 = arith.constant 0 : index
    %c0_45 = arith.constant 0 : index
    %120 = vector.load %arg9[%c0_44, %c0_45] : memref<1x32xf32, #tpu.memory_space<vmem>>, vector<1x32xf32>
    %121 = vector.broadcast %120 : vector<1x32xf32> to vector<16x32xf32>
    %122 = arith.mulf %119, %121 : vector<16x32xf32>
    %c0_46 = arith.constant 0 : index
    %c0_47 = arith.constant 0 : index
    %123 = vector.load %arg10[%c0_46, %c0_47] : memref<1x32xf32, #tpu.memory_space<vmem>>, vector<1x32xf32>
    %124 = vector.broadcast %123 : vector<1x32xf32> to vector<16x32xf32>
    %125 = arith.addf %122, %124 : vector<16x32xf32>
    %c0_48 = arith.constant 0 : index
    %c0_49 = arith.constant 0 : index
    %126 = vector.load %arg11[%c0_48, %c0_49] : memref<16x32xf32, #tpu.memory_space<vmem>>, vector<16x32xf32>
    tpu.vector_store %arg11[%c0_48, %c0_49], %125 {strides = array<i32>} : memref<16x32xf32, #tpu.memory_space<vmem>>, vector<16x32xf32>,
    return
  }
  func.func @transform_0(%arg0: i32) -> (i32, i32) {
    %c0_i32 = arith.constant 0 : i32
    %c0_i32_0 = arith.constant 0 : i32
    return %arg0, %c0_i32 : i32, i32
  }
  func.func @transform_1(%arg0: i32) -> (i32, i32) {
    %c0_i32 = arith.constant 0 : i32
    %c0_i32_0 = arith.constant 0 : i32
    return %arg0, %c0_i32 : i32, i32
  }
  func.func @transform_2(%arg0: i32) -> (i32, i32) {
    %c0_i32 = arith.constant 0 : i32
    %c0_i32_0 = arith.constant 0 : i32
    %c0_i32_1 = arith.constant 0 : i32
    return %c0_i32, %c0_i32_0 : i32, i32
  }
  func.func @transform_3(%arg0: i32) -> (i32, i32) {
    %c0_i32 = arith.constant 0 : i32
    %c0_i32_0 = arith.constant 0 : i32
    %c0_i32_1 = arith.constant 0 : i32
    return %c0_i32, %c0_i32_0 : i32, i32
  }
  func.func @transform_4(%arg0: i32) -> (i32, i32) {
    %c0_i32 = arith.constant 0 : i32
    %c0_i32_0 = arith.constant 0 : i32
    %c0_i32_1 = arith.constant 0 : i32
    return %c0_i32, %c0_i32_0 : i32, i32
  }
  func.func @transform_5(%arg0: i32) -> (i32, i32) {
    %c0_i32 = arith.constant 0 : i32
    %c0_i32_0 = arith.constant 0 : i32
    %c0_i32_1 = arith.constant 0 : i32
    return %c0_i32, %c0_i32_0 : i32, i32
  }
  func.func @transform_6(%arg0: i32) -> (i32, i32) {
    %c0_i32 = arith.constant 0 : i32
    %c0_i32_0 = arith.constant 0 : i32
    %c0_i32_1 = arith.constant 0 : i32
    return %c0_i32, %c0_i32_0 : i32, i32
  }
  func.func @transform_7(%arg0: i32) -> (i32, i32) {
    %c0_i32 = arith.constant 0 : i32
    %c0_i32_0 = arith.constant 0 : i32
    %c0_i32_1 = arith.constant 0 : i32
    return %c0_i32, %c0_i32_0 : i32, i32
  }
  func.func @transform_8(%arg0: i32) -> (i32, i32) {
    %c0_i32 = arith.constant 0 : i32
    %c0_i32_0 = arith.constant 0 : i32
    %c0_i32_1 = arith.constant 0 : i32
    return %c0_i32, %c0_i32_0 : i32, i32
  }
  func.func @transform_9(%arg0: i32) -> (i32, i32) {
    %c0_i32 = arith.constant 0 : i32
    %c0_i32_0 = arith.constant 0 : i32
    %c0_i32_1 = arith.constant 0 : i32
    return %c0_i32, %c0_i32_0 : i32, i32
  }
  func.func @transform_10(%arg0: i32) -> (i32, i32) {
    %c0_i32 = arith.constant 0 : i32
    %c0_i32_0 = arith.constant 0 : i32
    return %arg0, %c0_i32 : i32, i32
  }
  func.func @transform_11(%arg0: i32) -> (i32, i32) {
    %c0_i32 = arith.constant 0 : i32
    %c0_i32_0 = arith.constant 0 : i32
    return %arg0, %c0_i32 : i32, i32
  }
}

</mosaic_0001>

<bundles_post_ra>
// kernel: tpu_custom_call.1
= control target key start
LH: loop header
LB: loop body
LE: loop exit
PB: predicated region body
PF: predicated region fallthrough
CT: control target
= control target key end

     0   :  { %17 = vsyncpa [#allocation3], 0  ;;  %s2958_s0 = inlined_call_operand.hbm [shape: f32[16,32], index: 0, kind: input, shape index: {}]   ;;  %s2959_s1 = inlined_call_operand.hbm [shape: f32[16,64], index: 1, kind: input, shape index: {}]   ;;  %s2960_s2 = inlined_call_operand.hbm [shape: f32[32,32], index: 2, kind: input, shape index: {}]   ;;  %s2961_s3 = inlined_call_operand.vmem [shape: f32[1,32], index: 3, kind: input, shape index: {}]   ;;  %s2962_s4 = inlined_call_operand.hbm [shape: f32[64,64], index: 4, kind: input, shape index: {}]   ;;  %s2963_s5 = inlined_call_operand.vmem [shape: f32[1,64], index: 5, kind: input, shape index: {}]   ;;  %s2964_s6 = inlined_call_operand.hbm [shape: f32[32,32], index: 6, kind: input, shape index: {}]   ;;  %s2965_s7 = inlined_call_operand.vmem [shape: f32[1,32], index: 7, kind: input, shape index: {}]   ;;  %s2966_s8 = inlined_call_operand.vmem [shape: f32[1,32], index: 8, kind: input, shape index: {}]   ;;  %s2967_s9 = inlined_call_operand.vmem [shape: f32[1,32], index: 9, kind: input, shape index: {}]   ;;  %s2968_s10 = inlined_call_operand.hbm [shape: f32[16,32], index: 10, kind: output, shape index: {0}]   ;;  %s2969_s11 = inlined_call_operand.hbm [shape: f32[16,32], index: 11, kind: output, shape index: {1}]  }
   0x1   :  { %18 = vsyncpa [#allocation6], 0 }
   0x2   :  { %19 = vsyncpa [#allocation9], 0 }
   0x3   :  { %20 = vsyncpa [#allocation4], 0 }
   0x4   :  { %21 = vsyncpa [#allocation13], 0  ;;  %s2552_s17 = smov [#allocation5]   ;;  %s2553_s19 = smov [#allocation8]  }
   0x5   :  { %s39_s18 = sshll.u32 %s2552_s17, 4  ;;  %s65_s20 = sshll.u32 %s2553_s19, 4  ;;  %s40_s18 = int_to_ptr.vmem [resolvable:$true] %s39_s18  ;;  %s2632_s20 = int_to_ptr.vmem [resolvable:$true] %s65_s20 }
   0x6   :  { %s2388_s23 = scalar_lea.hbm %s2959_s1, 256 }
   0x7   :  { %p2389_p0 = scmp.ne.s32.totalorder %s2959_s1, %s2388_s23  ;;  %p2392_p1 = scmp.lt.u32.totalorder %s2388_s23, %s2959_s1 }
   0x9   :  { %p2394_p2 = pnand %p2392_p1, %p2389_p0 }
   0xb   :  { %2397 = shalt.err (!%p2394_p2)
}
   0xc   :  { %s2398_s28 = scalar_lea.vmem %s40_s18, 256  ;;  %p2403_p4 = scmp.lt.s32.totalorder %s40_s18, %s40_s18 }
   0xd   :  { %p2399_p3 = scmp.ne.s32.totalorder %s40_s18, %s2398_s28  ;;  %p2404_p5 = scmp.lt.s32.totalorder %s2398_s28, %s2398_s28 }
   0xf   :  { %p2405_p6 = por %p2404_p5, %p2403_p4 }
  0x11   :  { %p2406_p7 = pnand %p2405_p6, %p2399_p3 }
  0x13   :  { %2409 = shalt.err (!%p2406_p7)
}
  0x14   :  { %s2554_s29 = smov 128   ;;  %s2555_s30 = smov 8  }
  0x15   :  { %45 = dma.hbm_to_vmem [thread:$0]  %s2959_s1, 256, %s40_s18, [#allocation6], %s2554_s29, %s2554_s29, %s2555_s30  }
  0x16   :  { %s2410_s16 = scalar_lea.hbm %s2962_s4, 1024 }
  0x17   :  { %p2411_p8 = scmp.ne.s32.totalorder %s2962_s4, %s2410_s16  ;;  %p2414_p9 = scmp.lt.u32.totalorder %s2410_s16, %s2962_s4 }
  0x19   :  { %p2416_p10 = pnand %p2414_p9, %p2411_p8 }
  0x1b   :  { %2419 = shalt.err (!%p2416_p10)
}
  0x1c   :  { %s2420_s23 = scalar_lea.vmem %s2632_s20, 1024  ;;  %p2425_p12 = scmp.lt.s32.totalorder %s2632_s20, %s2632_s20 }
  0x1d   :  { %p2421_p11 = scmp.ne.s32.totalorder %s2632_s20, %s2420_s23  ;;  %p2426_p13 = scmp.lt.s32.totalorder %s2420_s23, %s2420_s23 }
  0x1f   :  { %p2427_p0 = por %p2426_p13, %p2425_p12 }
  0x21   :  { %p2428_p1 = pnand %p2427_p0, %p2421_p11 }
  0x23   :  { %2431 = shalt.err (!%p2428_p1)
}
  0x24   :  { %71 = dma.hbm_to_vmem [thread:$0]  %s2962_s4, 1024, %s2632_s20, [#allocation9], %s2554_s29, %s2554_s29, %s2555_s30  }
  0x25   :  { %s2556_s24 = smov [#allocation2]   ;;  %s2557_s26 = smov [#allocation7]  }
  0x26   :  { %s27_s25 = sshll.u32 %s2556_s24, 4  ;;  %s51_s27 = sshll.u32 %s2557_s26, 4  ;;  %s28_s25 = int_to_ptr.vmem [resolvable:$true] %s27_s25  ;;  %s2669_s27 = int_to_ptr.vmem [resolvable:$true] %s51_s27 }
  0x27   :  { %s2432_s13 = scalar_lea.hbm %s2958_s0, 256 }
  0x28   :  { %p2433_p2 = scmp.ne.s32.totalorder %s2958_s0, %s2432_s13  ;;  %p2436_p3 = scmp.lt.u32.totalorder %s2432_s13, %s2958_s0 }
  0x2a   :  { %p2438_p4 = pnand %p2436_p3, %p2433_p2 }
  0x2c   :  { %2441 = shalt.err (!%p2438_p4)
}
  0x2d   :  { %s2442_s4 = scalar_lea.vmem %s28_s25, 256  ;;  %p2447_p6 = scmp.lt.s32.totalorder %s28_s25, %s28_s25 }
  0x2e   :  { %p2443_p5 = scmp.ne.s32.totalorder %s28_s25, %s2442_s4  ;;  %p2448_p7 = scmp.lt.s32.totalorder %s2442_s4, %s2442_s4 }
  0x30   :  { %p2449_p8 = por %p2448_p7, %p2447_p6 }
  0x32   :  { %p2450_p9 = pnand %p2449_p8, %p2443_p5 }
  0x34   :  { %2453 = shalt.err (!%p2450_p9)
}
  0x35   :  { %33 = dma.hbm_to_vmem [thread:$0]  %s2958_s0, 256, %s28_s25, [#allocation3], %s2554_s29, %s2554_s29, %s2555_s30  }
  0x36   :  { %s2454_s23 = scalar_lea.hbm %s2960_s2, 512 }
  0x37   :  { %p2455_p10 = scmp.ne.s32.totalorder %s2960_s2, %s2454_s23  ;;  %p2458_p11 = scmp.lt.u32.totalorder %s2454_s23, %s2960_s2 }
  0x39   :  { %p2460_p12 = pnand %p2458_p11, %p2455_p10 }
  0x3b   :  { %2463 = shalt.err (!%p2460_p12)
}
  0x3c   :  { %s2464_s28 = scalar_lea.vmem %s2669_s27, 512  ;;  %p2469_p0 = scmp.lt.s32.totalorder %s2669_s27, %s2669_s27 }
  0x3d   :  { %p2465_p13 = scmp.ne.s32.totalorder %s2669_s27, %s2464_s28  ;;  %p2470_p1 = scmp.lt.s32.totalorder %s2464_s28, %s2464_s28 }
  0x3f   :  { %p2471_p2 = por %p2470_p1, %p2469_p0 }
  0x41   :  { %p2472_p3 = pnand %p2471_p2, %p2465_p13 }
  0x43   :  { %2475 = shalt.err (!%p2472_p3)
}
  0x44   :  { %57 = dma.hbm_to_vmem [thread:$0]  %s2960_s2, 512, %s2669_s27, [#allocation6], %s2554_s29, %s2554_s29, %s2555_s30  }
  0x45   :  { %s2558_s12 = smov [#allocation10]   ;;  %s2476_s16 = scalar_lea.hbm %s2964_s6, 512 }
  0x46   :  { %s79_s13 = sshll.u32 %s2558_s12, 4  ;;  %p2477_p4 = scmp.ne.s32.totalorder %s2964_s6, %s2476_s16  ;;  %s80_s13 = int_to_ptr.vmem [resolvable:$true] %s79_s13 }
  0x47   :  { %p2480_p5 = scmp.lt.u32.totalorder %s2476_s16, %s2964_s6 }
  0x49   :  { %p2482_p6 = pnand %p2480_p5, %p2477_p4 }
  0x4b   :  { %2485 = shalt.err (!%p2482_p6)
}
  0x4c   :  { %s2486_s21 = scalar_lea.vmem %s80_s13, 512  ;;  %p2491_p8 = scmp.lt.s32.totalorder %s80_s13, %s80_s13 }
  0x4d   :  { %p2487_p7 = scmp.ne.s32.totalorder %s80_s13, %s2486_s21  ;;  %p2492_p9 = scmp.lt.s32.totalorder %s2486_s21, %s2486_s21 }
  0x4f   :  { %p2493_p10 = por %p2492_p9, %p2491_p8 }
  0x51   :  { %p2494_p11 = pnand %p2493_p10, %p2487_p7 }
  0x53   :  { %2497 = shalt.err (!%p2494_p11)
}
  0x54   :  { %85 = dma.hbm_to_vmem [thread:$0]  %s2964_s6, 512, %s80_s13, [#allocation9], %s2554_s29, %s2554_s29, %s2555_s30  }
  0x55   :  { %2542 = dma.done.wait [#allocation3], 256  }
  0x56   :  { %2543 = vsyncadd [#allocation3], 4294967040 }
  0x57   :  { %2544 = dma.done.wait [#allocation6], 768  }
  0x58   :  { %2545 = vsyncadd [#allocation6], 4294966528 }
  0x59   :  { %2546 = dma.done.wait [#allocation9], 1536  }
  0x5a   :  { %2547 = vsyncadd [#allocation9], 4294965760  ;;  %v204_v0 = vld [vmem:[#allocation8] sm:$0xff]  ;;  %v205_v1 = vld [vmem:[#allocation8 + $0x8] sm:$0xff]  ;;  %vm219_vm0 = vcmask 523264   ;;  %vm122_vm1 = vcmask 261120  }
  0x5b   :  { %v206_v2 = vld [vmem:[#allocation8 + $0x10] sm:$0xff]  ;;  %v2310_v3 = vpack.c.bf16 %v205_v1, %v204_v0  ;;  %v207_v4 = vld [vmem:[#allocation8 + $0x18] sm:$0xff]  ;;  %v208_v5 = vld [vmem:[#allocation8 + $0x20] sm:$0xff]  ;;  %v2559_v22 = vmov 0.0   ;;  %vm2560_vm2 = vmmov 0   ;;  %vm305_vm3 = vcmask 64512  }
  0x5c   :  { %v2314_v6 = vpack.c.bf16 %v207_v4, %v206_v2  ;;  %v209_v7 = vld [vmem:[#allocation8 + $0x28] sm:$0xff]  ;;  %v111_v8 = vld [vmem:[#allocation7] sm:$0xff]  ;;  %v113_v11 = vld [vmem:[#allocation7 + $0x10] sm:$0xff]  ;;  %s2561_s18 = smov 96   ;;  %s2564_s24 = smov 112   ;;  %vm1970_vm4 = vcmask 130048  }
  0x5d   :  { %v112_v9 = vld [vmem:[#allocation7 + $0x8] sm:$0xff]  ;;  %2311 = vmatprep.subr.bf16.mxu1 %v2310_v3  ;;  %v114_v12 = vld [vmem:[#allocation7 + $0x18] sm:$0xff]  ;;  %v109_v14 = vld [vmem:[#allocation5] sm:$0xff]  ;;  %v2318_v16 = vpack.c.bf16 %v209_v7, %v208_v5  ;;  %s2565_s26 = smov 80   ;;  %s2566_s28 = smov 104   ;;  %vm1973_vm5 = vcmask 195584  }
  0x5e   :  { %v2302_v10 = vpack.c.bf16 %v112_v9, %v111_v8  ;;  %2313 = vmatpush3.bf16.msra.mxu1 %v2310_v3  ;;  %v2306_v13 = vpack.c.bf16 %v114_v12, %v113_v11  ;;  %v2721_v15 = vld [vmem:[#allocation2] sm:$0xff]  ;;  %v210_v17 = vld [vmem:[#allocation8 + $0x30] sm:$0xff]  ;;  %v211_v18 = vld [vmem:[#allocation8 + $0x38] sm:$0xff]  ;;  %2199 = vmatprep.mubr.msk.f32.mxu1 %vm219_vm0, %v109_v14  ;;  %s2567_s0 = smov 72   ;;  %s2569_s13 = smov 24  }
  0x5f   :  { %2315 = vmatprep.subr.bf16.mxu1 %v2314_v6  ;;  %2180 = vmatprep.mubr.msk.f32.mxu0 %vm122_vm1, %v2721_v15  ;;  %v2322_v19 = vpack.c.bf16 %v211_v18, %v210_v17  ;;  %v2726_v20 = vld [vmem:[#allocation2 + $0x8] sm:$0xff]  ;;  %v110_v21 = vld [vmem:[#allocation5 + $0x8] sm:$0xff]  ;;  %v2074_v25 = vld [vmem:[%s2963_s5] ss:$0 sm:$0xff]  ;;  %s2563_s5 = smov 88   ;;  %s2570_s14 = smov [#allocation12]  }
  0x60   :  { %2303 = vmatprep.subr.bf16.mxu0 %v2302_v10  ;;  %v2071_v26 = vld [vmem:[%s2961_s3] ss:$0 sm:$0xff]  ;;  %s2562_s3 = smov 120   ;;  %s2053_s15 = sshll.u32 %s2570_s14, 4  ;;  %s2054_s15 = int_to_ptr.vmem [resolvable:$true] %s2053_s15 }
  0x61   :  { %2305 = vmatpush3.bf16.msra.mxu0 %v2302_v10  ;;  %s2498_s16 = scalar_lea.vmem %s2054_s15, 256  ;;  %p2503_p13 = scmp.lt.s32.totalorder %s2054_s15, %s2054_s15 }
  0x62   :  { %2307 = vmatprep.subr.bf16.mxu0 %v2306_v13  ;;  %2317 = vmatpush3.bf16.msra.mxu1 %v2314_v6  ;;  %p2499_p12 = scmp.ne.s32.totalorder %s2054_s15, %s2498_s16  ;;  %p2504_p0 = scmp.lt.s32.totalorder %s2498_s16, %s2498_s16 }
  0x63   :  { %2319 = vmatprep.subr.bf16.mxu1 %v2318_v16 }
  0x64   :  { %p2505_p1 = por %p2504_p0, %p2503_p13 }
  0x65   :  { %2309 = vmatpush3.bf16.msra.mxu0 %v2306_v13 }
  0x66   :  { %2321 = vmatpush3.bf16.msra.mxu1 %v2318_v16  ;;  %2207 = vmatprep.subr.mxu0 %v2559_v22  ;;  %p2506_p2 = pnand %p2505_p1, %p2499_p12 }
  0x67   :  { %2323 = vmatprep.subr.bf16.mxu1 %v2322_v19 }
  0x68   :  { %2181 = vmatmul.mubr.msk.f32.vlgmr.msra.gmra.mrb[0].mxu0 %vm122_vm1, %v2726_v20 }
  0x69   :  { %2209 = vmatprep.mubr.msk.f32.mxu0 %vm2560_vm2, %v2559_v22 }
  0x6a   :  { %2325 = vmatpush3.bf16.msra.mxu1 %v2322_v19 }
  0x6b   :  { %2202 = vmatprep.subr.mxu1 %v2559_v22 }
  0x6d   :  { %2200 = vmatmul.mubr.msk.f32.vlgmr.msra.gmra.mrb[0].mxu1 %vm219_vm0, %v110_v21 }
  0x6e   :  { %2204 = vmatprep.mubr.msk.f32.mxu1 %vm2560_vm2, %v2559_v22 }
 0x13b   :  { %v2182_v23 = vpop.f32.mrb[0].mxu0 }
 0x13c   :  { %v195_v24 = vpop.f32.mrb[1].mxu0  ;;  %v2747_v31 = vadd.f32 %v2182_v23, %v2071_v26 }
 0x13d   :  { %v2752_v32 = vadd.f32 %v2071_v26, %v195_v24 }
 0x140   :  { %v2201_v27 = vpop.f32.mrb[0].mxu1 }
 0x141   :  { %v2743_v28 = vadd.f32 %v2201_v27, %v2074_v25  ;;  %v292_v29 = vpop.f32.mrb[1].mxu1 }
 0x142   :  { %v2745_v30 = vadd.f32 %v2074_v25, %v292_v29 }
 0x143   :  { %556 = vrot.lane.b32.xlu1 %v2743_v28, %s2561_s18  ;;  %2208 = vmatpush3.xpose.msk.msra.mxu0 %vm305_vm3, %v2743_v28 }
 0x144   :  { %2203 = vmatpush3.xpose.msk.msra.mxu1 %vm305_vm3, %v2745_v30  ;;  %2212 = vmatprep.subr.mxu0 %v2559_v22 }
 0x145   :  { %2217 = vmatprep.subr.mxu1 %v2559_v22 }
 0x146   :  { %2210 = vmatmul.mubr.msk.f32.vlgmr.msra.gmra.mrb[2].mxu0 %vm305_vm3, %v2747_v31 }
 0x147   :  { %712 = vrot.lane.b32.xlu1 %v2743_v28, %s2562_s3  ;;  %2205 = vmatmul.mubr.msk.f32.vlgmr.msra.gmra.mrb[2].mxu1 %vm305_vm3, %v2752_v32 }
 0x148   :  { %2219 = vmatprep.mubr.msk.f32.mxu1 %vm2560_vm2, %v2559_v22  ;;  %2214 = vmatprep.mubr.msk.f32.mxu0 %vm2560_vm2, %v2559_v22 }
 0x1b5   :  { %v557_v33 = vpop.permute.xlu1 %556 }
 0x1b6   :  { %2218 = vmatpush3.msra.mxu1 %v557_v33 }
 0x1b7   :  { %2227 = vmatprep.subr.mxu1 %v2559_v22 }
 0x1b9   :  { %v713_v40 = vpop.permute.xlu1 %712 }
 0x219   :  { %v454_v34 = vpop.f32.mrb[2].mxu0 }
 0x21a   :  { %v378_v35 = vpop.f32.mrb[2].mxu1  ;;  %v2211_v36 = vpop.f32.mrb[3].mxu0  ;;  %v461_v37 = vsel %vm305_vm3, %v454_v34, -inf }
 0x21b   :  { %462 = vmax.xlane.f32.xlu0 %v461_v37  ;;  %v2206_v38 = vpop.f32.mrb[3].mxu1  ;;  %v458_v39 = vsel %vm305_vm3, %v378_v35, -inf  ;;  %v301_v36 = vld [vmem:[#allocation10] sm:$0xff] }
 0x21c   :  { %459 = vmax.xlane.f32.xlu1 %v458_v39 }
 0x22d   :  { %480 = vrot.lane.b32.xlu1 %v2745_v30, %s2561_s18 }
 0x231   :  { %632 = vrot.lane.b32.xlu1 %v2752_v32, %s2562_s3 }
 0x2a8   :  { %v463_v41 = vpop.xlane.xlu0 %462 }
 0x2a9   :  { %v465_v42 = vsub.f32 %v454_v34, %v463_v41  ;;  %v460_v43 = vpop.xlane.xlu1 %459 }
 0x2aa   :  { %v464_v48 = vsub.f32 %v378_v35, %v460_v43  ;;  %v302_v35 = vld [vmem:[#allocation10 + $0x8] sm:$0xff] }
 0x2ab   :  { %v468_v44 = vmul.f32 1.442695, %v465_v42 }
 0x2ac   :  { %v466_v49 = vmul.f32 1.442695, %v464_v48 }
 0x2ad   :  { %2352 = vpow2.f32 %v468_v44  ;;  %v481_v45 = vpop.permute.xlu1 %480 }
 0x2ae   :  { %2213 = vmatpush3.msra.mxu0 %v481_v45  ;;  %2354 = vpow2.f32 %v466_v49 }
 0x2af   :  { %2222 = vmatprep.subr.mxu0 %v2559_v22 }
 0x2b1   :  { %v633_v60 = vpop.permute.xlu1 %632 }
 0x2b7   :  { %v2353_v46 = vpop.eup %2352 }
 0x2b8   :  { %v473_v47 = vsel %vm305_vm3, %v2353_v46, 0.0  ;;  %v2355_v50 = vpop.eup %2354 }
 0x2b9   :  { %474 = vadd.xlane.f32.xlu0 %v473_v47  ;;  %v470_v51 = vsel %vm305_vm3, %v2355_v50, 0.0 }
 0x2cf   :  { %710 = vrot.lane.b32.xlu0 %v2747_v31, %s2562_s3 }
 0x2ee   :  { %471 = vadd.xlane.f32.xlu0 %v470_v51 }
 0x304   :  { %634 = vrot.lane.b32.xlu0 %v2745_v30, %s2562_s3 }
 0x346   :  { %v475_v52 = vpop.xlane.xlu0 %474 }
 0x347   :  { %2356 = vrcp.f32 %v475_v52 }
 0x34a   :  { %v711_v55 = vpop.permute.xlu0 %710 }
 0x351   :  { %v2357_v53 = vpop.eup %2356 }
 0x352   :  { %v2781_v54 = vmul.f32 %v2357_v53, %v2353_v46 }
 0x354   :  { %2220 = vmatmul.mubr.msk.f32.vlgmr.msra.gmra.mrb[4].mxu1 %vm305_vm3, %v2781_v54 }
 0x355   :  { %2228 = vmatpush3.xpose.msk.msra.mxu1 %vm305_vm3, %v713_v40  ;;  %2229 = vmatprep.mubr.msk.f32.mxu1 %vm2560_vm2, %v2559_v22 }
 0x356   :  { %2237 = vmatprep.subr.mxu1 %v2559_v22 }
 0x358   :  { %2230 = vmatmul.mubr.msk.f32.vlgmr.msra.gmra.mrb[6].mxu1 %vm305_vm3, %v711_v55 }
 0x359   :  { %2239 = vmatprep.mubr.msk.f32.mxu1 %vm2560_vm2, %v2559_v22 }
 0x37b   :  { %v472_v56 = vpop.xlane.xlu0 %471 }
 0x37c   :  { %2358 = vrcp.f32 %v472_v56 }
 0x37f   :  { %v635_v59 = vpop.permute.xlu0 %634 }
 0x386   :  { %v2359_v57 = vpop.eup %2358 }
 0x387   :  { %v2792_v58 = vmul.f32 %v2359_v57, %v2355_v50 }
 0x389   :  { %2215 = vmatmul.mubr.msk.f32.vlgmr.msra.gmra.mrb[4].mxu0 %vm305_vm3, %v2792_v58 }
 0x38a   :  { %2223 = vmatpush3.xpose.msk.msra.mxu0 %vm305_vm3, %v635_v59  ;;  %2224 = vmatprep.mubr.msk.f32.mxu0 %vm2560_vm2, %v2559_v22 }
 0x38b   :  { %2232 = vmatprep.subr.mxu0 %v2559_v22 }
 0x38d   :  { %2225 = vmatmul.mubr.msk.f32.vlgmr.msra.gmra.mrb[6].mxu0 %vm305_vm3, %v633_v60 }
 0x38e   :  { %2234 = vmatprep.mubr.msk.f32.mxu0 %vm2560_vm2, %v2559_v22 }
 0x427   :  { %v2803_v61 = vpop.f32.mrb[4].mxu1 }
 0x428   :  { %v2221_v62 = vpop.f32.mrb[5].mxu1 }
 0x42b   :  { %v784_v63 = vpop.f32.mrb[6].mxu1 }
 0x42c   :  { %v2231_v0 = vpop.f32.mrb[7].mxu1  ;;  %v791_v1 = vsel %vm305_vm3, %v784_v63, -inf }
 0x42d   :  { %792 = vmax.xlane.f32.xlu1 %v791_v1 }
 0x43e   :  { %886 = vrot.lane.b32.xlu1 %v2743_v28, %s2563_s5 }
 0x442   :  { %1124 = vrot.lane.b32.xlu1 %v2752_v32, %s2564_s24 }
 0x446   :  { %1204 = vrot.lane.b32.xlu1 %v2743_v28, %s2564_s24 }
 0x44a   :  { %1202 = vrot.lane.b32.xlu1 %v2747_v31, %s2564_s24 }
 0x45c   :  { %v2810_v2 = vpop.f32.mrb[4].mxu0 }
 0x45d   :  { %v2216_v3 = vpop.f32.mrb[5].mxu0 }
 0x460   :  { %v706_v4 = vpop.f32.mrb[6].mxu0 }
 0x461   :  { %v2226_v5 = vpop.f32.mrb[7].mxu0  ;;  %v788_v6 = vsel %vm305_vm3, %v706_v4, -inf }
 0x46e   :  { %789 = vmax.xlane.f32.xlu1 %v788_v6 }
 0x47f   :  { %810 = vrot.lane.b32.xlu1 %v2745_v30, %s2563_s5 }
 0x483   :  { %1378 = vrot.lane.b32.xlu1 %v2743_v28, %s2565_s26 }
 0x487   :  { %1539 = vrot.lane.b32.xlu1 %v2745_v30, %s2566_s28 }
 0x48b   :  { %1617 = vrot.lane.b32.xlu1 %v2743_v28, %s2566_s28 }
 0x48f   :  { %1537 = vrot.lane.b32.xlu1 %v2752_v32, %s2566_s28 }
 0x493   :  { %1615 = vrot.lane.b32.xlu1 %v2747_v31, %s2566_s28 }
 0x4ba   :  { %v793_v7 = vpop.xlane.xlu1 %792 }
 0x4bb   :  { %v795_v8 = vsub.f32 %v784_v63, %v793_v7 }
 0x4bd   :  { %v798_v9 = vmul.f32 1.442695, %v795_v8 }
 0x4be   :  { %v887_v10 = vpop.permute.xlu1 %886 }
 0x4bf   :  { %2360 = vpow2.f32 %v798_v9  ;;  %2238 = vmatpush3.msra.mxu1 %v887_v10 }
 0x4c0   :  { %2252 = vmatprep.subr.mxu1 %v2559_v22 }
 0x4c2   :  { %v1125_v13 = vpop.permute.xlu1 %1124 }
 0x4c6   :  { %v1205_v14 = vpop.permute.xlu1 %1204 }
 0x4c9   :  { %v2361_v11 = vpop.eup %2360 }
 0x4ca   :  { %v803_v12 = vsel %vm305_vm3, %v2361_v11, 0.0  ;;  %v1203_v16 = vpop.permute.xlu1 %1202 }
 0x4cb   :  { %804 = vadd.xlane.f32.xlu0 %v803_v12 }
 0x4e1   :  { %1126 = vrot.lane.b32.xlu0 %v2745_v30, %s2564_s24 }
 0x4fb   :  { %v790_v17 = vpop.xlane.xlu1 %789 }
 0x4fc   :  { %v794_v18 = vsub.f32 %v706_v4, %v790_v17 }
 0x4fe   :  { %v796_v19 = vmul.f32 1.442695, %v794_v18 }
 0x4ff   :  { %v811_v21 = vpop.permute.xlu1 %810 }
 0x500   :  { %2362 = vpow2.f32 %v796_v19  ;;  %2233 = vmatpush3.msra.mxu0 %v811_v21 }
 0x501   :  { %2242 = vmatprep.subr.mxu0 %v302_v35 }
 0x503   :  { %v1379_v31 = vpop.permute.xlu1 %1378 }
 0x507   :  { %v1540_v63 = vpop.permute.xlu1 %1539 }
 0x50a   :  { %v2363_v23 = vpop.eup %2362 }
 0x50b   :  { %v800_v24 = vsel %vm305_vm3, %v2363_v23, 0.0  ;;  %v1618_v3 = vpop.permute.xlu1 %1617 }
 0x50c   :  { %801 = vadd.xlane.f32.xlu0 %v800_v24 }
 0x50f   :  { %v1538_v5 = vpop.permute.xlu1 %1537 }
 0x513   :  { %v1616_v10 = vpop.permute.xlu1 %1615 }
 0x558   :  { %v805_v25 = vpop.xlane.xlu0 %804 }
 0x559   :  { %2364 = vrcp.f32 %v805_v25 }
 0x55c   :  { %v1127_v29 = vpop.permute.xlu0 %1126 }
 0x563   :  { %v2365_v26 = vpop.eup %2364 }
 0x564   :  { %v2824_v27 = vmul.f32 %v2365_v26, %v2361_v11 }
 0x566   :  { %2240 = vmatmul.mubr.msk.f32.vlgmr.msra.gmra.mrb[8].mxu1 %vm305_vm3, %v2824_v27 }
 0x567   :  { %2253 = vmatpush3.xpose.msk.msra.mxu1 %vm305_vm3, %v1127_v29  ;;  %2254 = vmatprep.mubr.msk.f32.mxu1 %vm2560_vm2, %v2559_v22 }
 0x568   :  { %2257 = vmatprep.subr.mxu1 %v2559_v22 }
 0x56a   :  { %2255 = vmatmul.mubr.msk.f32.vlgmr.msra.gmra.mrb[10].mxu1 %vm305_vm3, %v1125_v13 }
 0x56b   :  { %2258 = vmatpush3.xpose.msk.msra.mxu1 %vm305_vm3, %v1205_v14  ;;  %2259 = vmatprep.mubr.msk.f32.mxu1 %vm2560_vm2, %v2559_v22 }
 0x56c   :  { %2267 = vmatprep.subr.mxu1 %v2559_v22 }
 0x56e   :  { %2260 = vmatmul.mubr.msk.f32.vlgmr.msra.gmra.mrb[12].mxu1 %vm305_vm3, %v1203_v16 }
 0x56f   :  { %2268 = vmatpush3.msra.mxu1 %v1379_v31  ;;  %2269 = vmatprep.mubr.msk.f32.mxu1 %vm2560_vm2, %v2559_v22 }
 0x570   :  { %2277 = vmatprep.subr.mxu1 %v2559_v22 }
 0x599   :  { %v802_v32 = vpop.xlane.xlu0 %801 }
 0x59a   :  { %2366 = vrcp.f32 %v802_v32 }
 0x5a4   :  { %v2367_v33 = vpop.eup %2366 }
 0x5a5   :  { %v2841_v34 = vmul.f32 %v2367_v33, %v2363_v23 }
 0x5a7   :  { %2235 = vmatmul.mubr.msk.f32.vlgmr.msra.gmra.mrb[8].mxu0 %vm305_vm3, %v2841_v34 }
 0x5a8   :  { %2243 = vmatpush3.msra.mxu0 %v302_v35 }
 0x5a9   :  { %2247 = vmatprep.subr.mxu0 %v301_v36 }
 0x639   :  { %v958_v37 = vpop.f32.mrb[8].mxu1 }
 0x63a   :  { %v2241_v38 = vpop.f32.mrb[9].mxu1 }
 0x63d   :  { %v1198_v39 = vpop.f32.mrb[10].mxu1 }
 0x63e   :  { %v2256_v40 = vpop.f32.mrb[11].mxu1  ;;  %v1280_v41 = vsel %vm305_vm3, %v1198_v39, -inf }
 0x63f   :  { %1281 = vmax.xlane.f32.xlu0 %v1280_v41 }
 0x641   :  { %v1276_v42 = vpop.f32.mrb[12].mxu1 }
 0x642   :  { %v2261_v43 = vpop.f32.mrb[13].mxu1  ;;  %v1283_v44 = vsel %vm305_vm3, %v1276_v42, -inf }
 0x643   :  { %1284 = vmax.xlane.f32.xlu0 %v1283_v44 }
 0x67a   :  { %v882_v45 = vpop.f32.mrb[8].mxu0 }
 0x67b   :  { %v2236_v46 = vpop.f32.mrb[9].mxu0  ;;  %2244 = vmatprep.mubr.msk.f32.mxu0 %vm305_vm3, %v882_v45 }
 0x67c   :  { %2245 = vmatmul.mubr.msk.f32.vlgmr.msra.gmra.mrb[10].mxu0 %vm305_vm3, %v958_v37 }
 0x67d   :  { %2249 = vmatprep.mubr.msk.f32.mxu0 %vm305_vm3, %v2810_v2  ;;  %2248 = vmatpush3.msra.mxu0 %v301_v36 }
 0x67e   :  { %2262 = vmatprep.subr.mxu0 %v2559_v22 }
 0x684   :  { %2250 = vmatmul.mubr.msk.f32.vlgmr.msra.gmra.mrb[10].mxu0 %vm305_vm3, %v2803_v61  ;;  %v303_v61 = vld [vmem:[#allocation10 + $0x10] sm:$0xff] }
 0x685   :  { %2264 = vmatprep.mubr.msk.f32.mxu0 %vm2560_vm2, %v2559_v22 }
 0x6cc   :  { %v1282_v47 = vpop.xlane.xlu0 %1281 }
 0x6cd   :  { %v1286_v48 = vsub.f32 %v1198_v39, %v1282_v47 }
 0x6cf   :  { %v1288_v49 = vmul.f32 1.442695, %v1286_v48 }
 0x6d0   :  { %v1285_v50 = vpop.xlane.xlu0 %1284 }
 0x6d1   :  { %2368 = vpow2.f32 %v1288_v49  ;;  %v1287_v51 = vsub.f32 %v1276_v42, %v1285_v50 }
 0x6d3   :  { %v1290_v52 = vmul.f32 1.442695, %v1287_v51 }
 0x6d5   :  { %2370 = vpow2.f32 %v1290_v52 }
 0x6db   :  { %v2369_v53 = vpop.eup %2368 }
 0x6dc   :  { %v1292_v55 = vsel %vm305_vm3, %v2369_v53, 0.0 }
 0x6dd   :  { %1293 = vadd.xlane.f32.xlu0 %v1292_v55 }
 0x6df   :  { %v2371_v56 = vpop.eup %2370 }
 0x6e0   :  { %v1295_v57 = vsel %vm305_vm3, %v2371_v56, 0.0 }
 0x6e1   :  { %1296 = vadd.xlane.f32.xlu0 %v1295_v57 }
 0x6f7   :  { %1302 = vrot.lane.b32.xlu0 %v2745_v30, %s2565_s26 }
 0x76a   :  { %v1294_v59 = vpop.xlane.xlu0 %1293 }
 0x76b   :  { %2372 = vrcp.f32 %v1294_v59 }
 0x76e   :  { %v1297_v60 = vpop.xlane.xlu0 %1296 }
 0x76f   :  { %2374 = vrcp.f32 %v1297_v60 }
 0x772   :  { %v1303_v62 = vpop.permute.xlu0 %1302 }
 0x773   :  { %2263 = vmatpush3.msra.mxu0 %v1303_v62 }
 0x774   :  { %2272 = vmatprep.subr.mxu0 %v303_v61 }
 0x775   :  { %v2373_v0 = vpop.eup %2372 }
 0x776   :  { %v2860_v1 = vmul.f32 %v2373_v0, %v2369_v53 }
 0x778   :  { %2265 = vmatmul.mubr.msk.f32.vlgmr.msra.gmra.mrb[12].mxu0 %vm305_vm3, %v2860_v1 }
 0x779   :  { %v2375_v2 = vpop.eup %2374  ;;  %2273 = vmatpush3.msra.mxu0 %v303_v61 }
 0x77a   :  { %v2864_v4 = vmul.f32 %v2375_v2, %v2371_v56  ;;  %2282 = vmatprep.subr.mxu0 %v2559_v22 }
 0x77c   :  { %2270 = vmatmul.mubr.msk.f32.vlgmr.msra.gmra.mrb[14].mxu1 %vm305_vm3, %v2864_v4 }
 0x77d   :  { %2278 = vmatpush3.xpose.msk.msra.mxu1 %vm305_vm3, %v1540_v63  ;;  %2279 = vmatprep.mubr.msk.f32.mxu1 %vm2560_vm2, %v2559_v22 }
 0x77e   :  { %2287 = vmatprep.subr.mxu1 %v2559_v22 }
 0x780   :  { %2280 = vmatmul.mubr.msk.f32.vlgmr.msra.gmra.mrb[16].mxu1 %vm305_vm3, %v1538_v5 }
 0x781   :  { %2289 = vmatprep.mubr.msk.f32.mxu1 %vm2560_vm2, %v2559_v22 }
 0x84b   :  { %v1374_v6 = vpop.f32.mrb[12].mxu0 }
 0x84c   :  { %v2266_v7 = vpop.f32.mrb[13].mxu0  ;;  %2274 = vmatprep.mubr.msk.f32.mxu0 %vm305_vm3, %v1374_v6 }
 0x84f   :  { %v1450_v8 = vpop.f32.mrb[14].mxu1 }
 0x850   :  { %v2271_v9 = vpop.f32.mrb[15].mxu1  ;;  %2275 = vmatmul.mubr.msk.f32.vlgmr.msra.gmra.mrb[10].mxu0 %vm305_vm3, %v1450_v8 }
 0x851   :  { %2283 = vmatpush3.xpose.msk.msra.mxu0 %vm305_vm3, %v1618_v3  ;;  %2284 = vmatprep.mubr.msk.f32.mxu0 %vm2560_vm2, %v2559_v22 }
 0x852   :  { %2292 = vmatprep.subr.mxu0 %v2559_v22 }
 0x853   :  { %v1611_v11 = vpop.f32.mrb[16].mxu1 }
 0x854   :  { %v2281_v12 = vpop.f32.mrb[17].mxu1  ;;  %2285 = vmatmul.mubr.msk.f32.vlgmr.msra.gmra.mrb[14].mxu0 %vm305_vm3, %v1616_v10  ;;  %v1693_v13 = vsel %vm305_vm3, %v1611_v11, -inf }
 0x855   :  { %1694 = vmax.xlane.f32.xlu1 %v1693_v13  ;;  %2294 = vmatprep.mubr.msk.f32.mxu0 %vm2560_vm2, %v2559_v22 }
 0x8e2   :  { %v1695_v14 = vpop.xlane.xlu1 %1694 }
 0x8e3   :  { %v1699_v16 = vsub.f32 %v1611_v11, %v1695_v14 }
 0x8e5   :  { %v1701_v17 = vmul.f32 1.442695, %v1699_v16 }
 0x8e7   :  { %2376 = vpow2.f32 %v1701_v17 }
 0x8f1   :  { %v2377_v23 = vpop.eup %2376 }
 0x8f2   :  { %v1705_v24 = vsel %vm305_vm3, %v2377_v23, 0.0 }
 0x927   :  { %v1689_v18 = vpop.f32.mrb[14].mxu0 }
 0x928   :  { %v2286_v19 = vpop.f32.mrb[15].mxu0  ;;  %v1696_v21 = vsel %vm305_vm3, %v1689_v18, -inf }
 0x929   :  { %1697 = vmax.xlane.f32.xlu0 %v1696_v21 }
 0x92d   :  { %1706 = vadd.xlane.f32.xlu0 %v1705_v24 }
 0x943   :  { %1715 = vrot.lane.b32.xlu0 %v2745_v30, %s2567_s0  ;;  %v304_v30 = vld [vmem:[#allocation10 + $0x18] sm:$0xff] }
 0x9b6   :  { %v1698_v25 = vpop.xlane.xlu0 %1697 }
 0x9b7   :  { %v1700_v26 = vsub.f32 %v1689_v18, %v1698_v25 }
 0x9b9   :  { %v1703_v29 = vmul.f32 1.442695, %v1700_v26 }
 0x9ba   :  { %v1707_v22 = vpop.xlane.xlu0 %1706 }
 0x9bb   :  { %2378 = vpow2.f32 %v1703_v29 }
 0x9bc   :  { %2380 = vrcp.f32 %v1707_v22 }
 0x9be   :  { %v1716_v31 = vpop.permute.xlu0 %1715 }
 0x9bf   :  { %2288 = vmatpush3.msra.mxu1 %v1716_v31 }
 0x9c5   :  { %v2379_v32 = vpop.eup %2378 }
 0x9c6   :  { %v2381_v33 = vpop.eup %2380  ;;  %v1708_v35 = vsel %vm305_vm3, %v2379_v32, 0.0 }
 0x9c7   :  { %v1713_v36 = vmul.f32 %v2381_v33, %v2377_v23  ;;  %1709 = vadd.xlane.f32.xlu1 %v1708_v35 }
 0x9c9   :  { %2290 = vmatmul.mubr.msk.f32.vlgmr.msra.gmra.mrb[18].mxu1 %vm305_vm3, %v1713_v36 }
 0x9d8   :  { %1791 = vrot.lane.b32.xlu1 %v2743_v28, %s2567_s0  ;;  %v2109_v28 = vld [vmem:[%s2965_s7] ss:$0 sm:$0xff]  ;;  %s2568_s7 = smov 16  }
 0xa54   :  { %v1710_v37 = vpop.xlane.xlu1 %1709 }
 0xa55   :  { %2382 = vrcp.f32 %v1710_v37 }
 0xa58   :  { %v1792_v38 = vpop.permute.xlu1 %1791 }
 0xa59   :  { %2293 = vmatpush3.msra.mxu0 %v1792_v38 }
 0xa5a   :  { %2297 = vmatprep.subr.mxu0 %v304_v30 }
 0xa5f   :  { %v2383_v39 = vpop.eup %2382 }
 0xa60   :  { %v1714_v40 = vmul.f32 %v2383_v39, %v2379_v32 }
 0xa62   :  { %2295 = vmatmul.mubr.msk.f32.vlgmr.msra.gmra.mrb[16].mxu0 %vm305_vm3, %v1714_v40 }
 0xa63   :  { %2298 = vmatpush3.msra.mxu0 %v304_v30 }
 0xa9c   :  { %v1787_v41 = vpop.f32.mrb[18].mxu1 }
 0xa9d   :  { %v2291_v42 = vpop.f32.mrb[19].mxu1  ;;  %2299 = vmatprep.mubr.msk.f32.mxu0 %vm305_vm3, %v1787_v41 }
 0xb35   :  { %v1863_v43 = vpop.f32.mrb[16].mxu0 }
 0xb36   :  { %v2296_v44 = vpop.f32.mrb[17].mxu0  ;;  %2300 = vmatmul.mubr.msk.f32.vlgmr.msra.gmra.mrb[10].mxu0 %vm305_vm3, %v1863_v43 }
 0xc09   :  { %v2301_v45 = vpop.f32.mrb[10].mxu0 }
 0xc0a   :  { %v1986_v46 = vadd.f32 %v2301_v45, %v2109_v28  ;;  %v1939_v47 = vpop.f32.mrb[11].mxu0 }
 0xc0b   :  { %v1985_v48 = vadd.f32 %v2109_v28, %v1939_v47 }
 0xc0c   :  { %v1988_v49 = vadd.f32 %v1986_v46, %v2726_v20 }
 0xc0d   :  { %v1987_v50 = vadd.f32 %v1985_v48, %v2721_v15 }
 0xc0e   :  { %v1992_v51 = vsel %vm122_vm1, %v1988_v49, 0.0 }
 0xc0f   :  { %1993 = vadd.xlane.f32.xlu0 %v1992_v51  ;;  %v1989_v52 = vsel %vm122_vm1, %v1987_v50, 0.0 }
 0xc10   :  { %1990 = vadd.xlane.f32.xlu1 %v1989_v52 }
 0xc21   :  { %1952 = vrot.lane.b32.xlu1 %v2824_v27, %s2555_s30 }
 0xc25   :  { %1950 = vrot.lane.b32.xlu0 %v2841_v34, %s2555_s30  ;;  %1956 = vrot.lane.b32.xlu1 %v2860_v1, %s2568_s7 }
 0xc9c   :  { %v1994_v53 = vpop.xlane.xlu0 %1993 }
 0xc9d   :  { %v1997_v55 = vmul.f32 0.03125, %v1994_v53  ;;  %v1991_v20 = vpop.xlane.xlu1 %1990 }
 0xc9e   :  { %v1996_v56 = vmul.f32 0.03125, %v1991_v20 }
 0xc9f   :  { %v1999_v15 = vsub.f32 %v1988_v49, %v1997_v55 }
 0xca0   :  { %v1998_v57 = vsub.f32 %v1987_v50, %v1996_v56  ;;  %v1951_v63 = vpop.permute.xlu0 %1950 }
 0xca1   :  { %v2001_v59 = vmul.f32 %v1999_v15, %v1999_v15  ;;  %v1953_v27 = vpop.permute.xlu1 %1952  ;;  %v1968_v5 = vsel %vm305_vm3, %v2792_v58, %v1951_v63 }
 0xca2   :  { %v2000_v60 = vmul.f32 %v1998_v57, %v1998_v57  ;;  %v1969_v11 = vsel %vm305_vm3, %v2781_v54, %v1953_v27 }
 0xca3   :  { %v2005_v61 = vsel %vm122_vm1, %v2001_v59, 0.0 }
 0xca4   :  { %2006 = vadd.xlane.f32.xlu1 %v2005_v61  ;;  %v2002_v62 = vsel %vm122_vm1, %v2000_v60, 0.0 }
 0xca5   :  { %2003 = vadd.xlane.f32.xlu0 %v2002_v62  ;;  %v1957_v34 = vpop.permute.xlu1 %1956 }
 0xca6   :  { %v1971_v7 = vsel %vm1970_vm4, %v1968_v5, %v1957_v34 }
 0xcb5   :  { %1962 = vrot.lane.b32.xlu1 %v1713_v36, %s2569_s13 }
 0xcbb   :  { %1958 = vrot.lane.b32.xlu0 %v2864_v4, %s2568_s7 }
 0xcbf   :  { %1964 = vrot.lane.b32.xlu0 %v1714_v40, %s2569_s13 }
 0xd31   :  { %v2007_v0 = vpop.xlane.xlu1 %2006 }
 0xd32   :  { %v2009_v1 = vmul.f32 0.03125, %v2007_v0  ;;  %v2004_v2 = vpop.xlane.xlu0 %2003 }
 0xd33   :  { %v2008_v3 = vmul.f32 0.03125, %v2004_v2 }
 0xd34   :  { %v2011_v6 = vadd.f32 1e-05, %v2009_v1 }
 0xd35   :  { %v2010_v8 = vadd.f32 1e-05, %v2008_v3  ;;  %v1963_v9 = vpop.permute.xlu1 %1962 }
 0xd36   :  { %2384 = vrsqrt.f32 %v2011_v6  ;;  %v1974_v4 = vsel %vm1973_vm5, %v1971_v7, %v1963_v9  ;;  %v1959_v10 = vpop.permute.xlu0 %1958 }
 0xd37   :  { %2386 = vrsqrt.f32 %v2010_v8  ;;  %1976 = vst.msk [vmem:[#allocation12] sm:$0xff] %vm122_vm1, %v1974_v4  ;;  %v1972_v12 = vsel %vm1970_vm4, %v1969_v11, %v1959_v10 }
 0xd3a   :  { %v1965_v58 = vpop.permute.xlu0 %1964 }
 0xd3b   :  { %v1975_v13 = vsel %vm1973_vm5, %v1972_v12, %v1965_v58 }
 0xd3c   :  { %1977 = vst.msk [vmem:[#allocation12 + $0x8] sm:$0xff] %vm122_vm1, %v1975_v13 }
 0xd3d   :  { %2509 = shalt.err (!%p2506_p2)
}
 0xd3e   :  { %s2510_s20 = scalar_lea.hbm %s2969_s11, 256 }
 0xd3f   :  { %p2511_p3 = scmp.ne.s32.totalorder %s2969_s11, %s2510_s20  ;;  %p2514_p4 = scmp.lt.u32.totalorder %s2510_s20, %s2969_s11 }
 0xd41   :  { %p2516_p5 = pnand %p2514_p4, %p2511_p3 }
 0xd43   :  { %2519 = shalt.err (!%p2516_p5)
}
 0xd44   :  { %2059 = dma.vmem_to_hbm [thread:$0]  %s2054_s15, 256, %s2969_s11, [#allocation13], %s2554_s29, %s2554_s29, %s2555_s30   ;;  %v2385_v54 = vpop.eup %2384 }
 0xd45   :  { %v2110_v14 = vld [vmem:[%s2966_s8] ss:$0 sm:$0xff]  ;;  %v2387_v16 = vpop.eup %2386  ;;  %v2015_v17 = vmul.f32 %v2385_v54, %v1999_v15  ;;  %s2571_s5 = smov [#allocation11]  }
 0xd46   :  { %v2014_v18 = vmul.f32 %v2387_v16, %v1998_v57  ;;  %v2111_v19 = vld [vmem:[%s2967_s9] ss:$0 sm:$0xff]  ;;  %s2041_s24 = sshll.u32 %s2571_s5, 4  ;;  %s2042_s24 = int_to_ptr.vmem [resolvable:$true] %s2041_s24 }
 0xd47   :  { %v2024_v21 = vmul.f32 %v2110_v14, %v2015_v17  ;;  %s2520_s11 = scalar_lea.vmem %s2042_s24, 256  ;;  %p2525_p7 = scmp.lt.s32.totalorder %s2042_s24, %s2042_s24 }
 0xd48   :  { %v2023_v23 = vmul.f32 %v2110_v14, %v2014_v18  ;;  %p2521_p6 = scmp.ne.s32.totalorder %s2042_s24, %s2520_s11  ;;  %p2526_p8 = scmp.lt.s32.totalorder %s2520_s11, %s2520_s11 }
 0xd49   :  { %v2033_v24 = vadd.f32 %v2111_v19, %v2024_v21 }
 0xd4a   :  { %v2032_v25 = vadd.f32 %v2111_v19, %v2023_v23  ;;  %p2527_p9 = por %p2526_p8, %p2525_p7 }
 0xd4b   :  { %2035 = vst.msk [vmem:[#allocation11 + $0x8] sm:$0xff] %vm122_vm1, %v2033_v24 }
 0xd4c   :  { %2034 = vst.msk [vmem:[#allocation11] sm:$0xff] %vm122_vm1, %v2032_v25  ;;  %p2528_p10 = pnand %p2527_p9, %p2521_p6 }
 0xd4e   :  { %2531 = shalt.err (!%p2528_p10)
}
 0xd4f   :  { %s2532_s26 = scalar_lea.hbm %s2968_s10, 256 }
 0xd50   :  { %p2533_p11 = scmp.ne.s32.totalorder %s2968_s10, %s2532_s26  ;;  %p2536_p12 = scmp.lt.u32.totalorder %s2532_s26, %s2968_s10 }
 0xd52   :  { %p2538_p13 = pnand %p2536_p12, %p2533_p11 }
 0xd54   :  { %2541 = shalt.err (!%p2538_p13)
}
 0xd55   :  { %2047 = dma.vmem_to_hbm [thread:$0]  %s2042_s24, 256, %s2968_s10, [#allocation4], %s2554_s29, %s2554_s29, %s2555_s30  }
 0xd56   :  { %2548 = dma.done.wait [#allocation4], 256  }
 0xd57   :  { %2549 = vsyncadd [#allocation4], 4294967040 }
 0xd58   :  { %2550 = dma.done.wait [#allocation13], 256  }
 0xd59   :  { %2551 = vsyncadd [#allocation13], 4294967040 }
 0xd5a   :  { %2066 = vsyncpa [#allocation3], 1 }
 0xd5b   :  { %2067 = vsyncpa [#allocation6], 1 }
 0xd5c   :  { %2068 = vsyncpa [#allocation9], 1 }
 0xd5d   :  { %2069 = vsyncpa [#allocation4], 1 }
 0xd5e   :  { %2070 = vsyncpa [#allocation13], 1 }

</bundles_post_ra>
